<compile_context>
chip_gen: v7x
topology: tpu7x:2x2x1
jax: 0.10.0
libtpu: 0.0.40
codegen_flags: <defaults>
</compile_context>

<pallas_src>
import math

import jax
import jax.numpy as jnp
from jax import lax
from jax.experimental import pallas as pl
from jax.experimental.pallas import tpu as pltpu


def _round_up(x, m):
    return ((x + m - 1) // m) * m


def _lcm(a, b):
    return a * b // math.gcd(a, b)


def _make_omega(d):
    # matches get_1d_sincos_pos_embed_from_grid_torch (float32 throughout)
    half = d // 2
    om = jnp.arange(half, dtype=jnp.float32) / (d / 2.0)
    return 1.0 / (10000.0 ** om)                                    # (half,)


def _build_table(embed_dim):
    """(3, embed_dim) f32 rows: [year-omega | day-omega | cos-mask]."""
    year_dim = embed_dim // 2
    day_dim = embed_dim - year_dim
    yh, dh = year_dim // 2, day_dim // 2
    om_y = _make_omega(year_dim)                                    # (yh,)
    om_d = _make_omega(day_dim)                                     # (dh,)
    zeros_y = jnp.zeros((year_dim,), jnp.float32)
    zeros_d = jnp.zeros((day_dim,), jnp.float32)
    mul_year = jnp.concatenate([om_y, om_y, zeros_d])               # (E,)
    mul_day = jnp.concatenate([zeros_y, om_d, om_d])                # (E,)
    cos_mask = jnp.concatenate([jnp.zeros((yh,), jnp.float32),
                                jnp.ones((yh,), jnp.float32),
                                jnp.zeros((dh,), jnp.float32),
                                jnp.ones((dh,), jnp.float32)])      # (E,)
    return jnp.stack([mul_year, mul_day, cos_mask], axis=0)         # (3, E)


def _compute_tile(scale_ref, coords_ref, table_ref):
    """Compute scale * sincos embedding for the whole (TM, W) tile (one store)."""
    year = coords_ref[:, 0:1]                                       # (TM, 1)
    day = coords_ref[:, 1:2]                                        # (TM, 1)
    mul_y = table_ref[0:1, :]                                       # (1, W)
    mul_d = table_ref[1:2, :]                                       # (1, W)
    cos_mask = table_ref[2:3, :] != 0.0                             # (1, W) bool
    angle = year * mul_y + day * mul_d                              # (TM, W)
    val = jnp.where(cos_mask, jnp.cos(angle), jnp.sin(angle))       # (TM, W)
    return scale_ref[0] * val


def _make_kernel(mode, W, embed_dim, reps, g, row_chunk):
    """Build the kernel body.

    Refs:
      scale_ref : (1,) f32 in SMEM
      coords_ref: (TM, 2) f32  [:, 0] = year, [:, 1] = day-of-year
      table_ref : (3, W) f32   [year-omega | day-omega | cos-mask] (pre-replicated)
      out_ref   : (TM, out_row)
      emb_ref   : (TM, W) VMEM scratch (grouped mode only)
    """
    if mode == "direct":
        def kernel(scale_ref, coords_ref, table_ref, out_ref):
            out_ref[...] = _compute_tile(scale_ref, coords_ref,
                                         table_ref).astype(out_ref.dtype)
        return kernel

    # grouped mode: compute once at lane-aligned width gE, copy reps//g times
    gE = W
    n_full = reps // g
    rem = reps % g

    def kernel(scale_ref, coords_ref, table_ref, out_ref, emb_ref):
        emb_ref[...] = _compute_tile(scale_ref, coords_ref,
                                     table_ref).astype(emb_ref.dtype)

        def copy_rows(rc, carry):
            row = pl.multiple_of(rc * row_chunk, row_chunk)
            chunk = emb_ref[pl.ds(row, row_chunk), :]        # few vregs live
            for k in range(n_full):                           # static, lane-aligned
                out_ref[pl.ds(row, row_chunk), k * gE:(k + 1) * gE] = chunk
            if rem:
                base = n_full * gE
                out_ref[pl.ds(row, row_chunk),
                        base:base + rem * embed_dim] = chunk[:, :rem * embed_dim]
            return carry

        lax.fori_loop(0, emb_ref.shape[0] // row_chunk, copy_rows, 0)

    return kernel


def temporal_encoder_forward(temporal_coords, scale, embed_dim,
                             tokens_per_frame=None, out_dtype=jnp.float32):
    """JAX/Pallas equivalent of TemporalEncoder.forward."""
    B, T, C = temporal_coords.shape
    assert C == 2
    year_dim = embed_dim // 2
    day_dim = embed_dim - year_dim
    assert year_dim % 2 == 0 and day_dim % 2 == 0

    E = embed_dim
    reps = 1 if tokens_per_frame is None else int(tokens_per_frame)
    out_row = reps * E
    M = B * T
    itemsize = jnp.dtype(out_dtype).itemsize

    # Smallest g with (g*E) % 128 == 0 -> lane-aligned store width.
    g = _lcm(E, 128) // E

    # Mode: recompute full width directly (small reps) vs compute-once + copies.
    if reps == 1 or reps <= g or out_row <= 1024:
        mode, tile_factor, W = "direct", reps, out_row
    else:
        mode, tile_factor, W = "grouped", g, g * E

    # Row tile: target ~4 MiB output block per buffer, rows multiple of 16
    # (bf16-safe packing); cap so there are >=2 grid steps when M allows (v7x).
    TM_ALIGN = 16
    target_block_bytes = 4 << 20
    tm = target_block_bytes // max(out_row * itemsize, 1)
    tm = max(TM_ALIGN, (tm // TM_ALIGN) * TM_ALIGN)
    m_ceil = _round_up(M, TM_ALIGN)
    if m_ceil >= 2 * TM_ALIGN:
        tm = min(tm, _round_up(-(-M // 2), TM_ALIGN))
    tm = min(tm, m_ceil)
    m_pad = _round_up(M, tm)
    grid = (m_pad // tm,)

    coords = temporal_coords.reshape(M, 2).astype(jnp.float32)
    if m_pad > M:
        coords = jnp.pad(coords, ((0, m_pad - M), (0, 0)))

    table = _build_table(E)                                          # (3, E)
    if tile_factor > 1:
        table = jnp.tile(table, (1, tile_factor))                    # (3, W)

    scale_arr = jnp.asarray(scale, dtype=jnp.float32).reshape(1)

    row_chunk = 8 if itemsize == 4 else 16
    kernel = _make_kernel(mode, W, E, reps, g, row_chunk)
    scratch_shapes = ([pltpu.VMEM((tm, W), out_dtype)]
                      if mode == "grouped" else [])

    out_block_bytes = tm * out_row * itemsize
    scratch_bytes = tm * W * itemsize if mode == "grouped" else 0
    vmem_needed = 2 * out_block_bytes + scratch_bytes + 2 * (tm * 2 * 4) + 2 * (3 * W * 4)
    vmem_limit = int(min(max(32 << 20, int(vmem_needed * 1.25)), 48 << 20))

    cost = pl.CostEstimate(
        flops=5 * m_pad * W + m_pad * out_row,
        transcendentals=2 * m_pad * W,
        bytes_accessed=m_pad * out_row * itemsize + m_pad * 2 * 4 + 3 * W * 4,
    )

    out = pl.pallas_call(
        kernel,
        out_shape=jax.ShapeDtypeStruct((m_pad, out_row), out_dtype),
        grid_spec=pltpu.PrefetchScalarGridSpec(
            num_scalar_prefetch=0,
            grid=grid,
            in_specs=[
                pl.BlockSpec(memory_space=pltpu.MemorySpace.SMEM),      # scale (1,)
                pl.BlockSpec((tm, 2), lambda i: (i, 0)),                # coords
                pl.BlockSpec((3, W), lambda i: (0, 0)),                 # omega/mask rows
            ],
            out_specs=pl.BlockSpec((tm, out_row), lambda i: (i, 0)),
            scratch_shapes=scratch_shapes,
        ),
        compiler_params=pltpu.CompilerParams(
            dimension_semantics=("parallel",),
            vmem_limit_bytes=vmem_limit),
        cost_estimate=cost,
    )(scale_arr, coords, table)

    # (M, reps*E) row-major == (B, T*reps, E) row-major (repeat_interleave fused).
    return out[:M].reshape(B, T * reps, E)


def _reference(temporal_coords, scale, embed_dim, tokens_per_frame=None):
    """Pure-JAX reference mirroring the PyTorch module."""
    B, T, _ = temporal_coords.shape
    year_d = embed_dim // 2
    day_d = embed_dim - year_d

    def sincos(d, pos):
        om = _make_omega(d).reshape(-1)
        out = pos.reshape(-1)[:, None].astype(jnp.float32) * om[None, :]
        return jnp.concatenate([jnp.sin(out), jnp.cos(out)], axis=1)

    year = sincos(year_d, temporal_coords[:, :, 0]).reshape(B, T, -1)
    day = sincos(day_d, temporal_coords[:, :, 1]).reshape(B, T, -1)
    emb = scale * jnp.concatenate([year, day], axis=-1)
    if tokens_per_frame is not None:
        emb = jnp.repeat(emb, tokens_per_frame, axis=1)
    return emb


if __name__ == "__main__":
    key = jax.random.PRNGKey(0)
    B, T, embed_dim = 2, 8, 32

    k_year, k_day = jax.random.split(key)
    years = jax.random.randint(k_year, (B, T, 1), 2000, 2021).astype(jnp.float32)
    days = jax.random.randint(k_day, (B, T, 1), 1, 366).astype(jnp.float32)
    temporal_coords = jnp.concatenate([years, days], axis=-1)        # (B, T, 2)

    # trainable_scale=False -> buffer scale = ones(1); deterministic init.
    scale = jnp.ones((1,), dtype=jnp.float32)

    # 1) small tokens_per_frame -> direct full-width (replicated-table) path.
    tpf = 4
    out = jax.block_until_ready(
        temporal_encoder_forward(temporal_coords, scale, embed_dim, tpf))
    ref = _reference(temporal_coords, scale, embed_dim, tpf)
    assert out.shape == (B, T * tpf, embed_dim)
    assert jnp.allclose(out, ref, atol=1e-5, rtol=1e-5)

    # 2) no tokens_per_frame.
    out2 = jax.block_until_ready(
        temporal_encoder_forward(temporal_coords, scale, embed_dim, None))
    ref2 = _reference(temporal_coords, scale, embed_dim, None)
    assert out2.shape == (B, T, embed_dim)
    assert jnp.allclose(out2, ref2, atol=1e-5, rtol=1e-5)

    # 3) large tokens_per_frame -> grouped compute-once + lane-aligned copies
    #    (exercises the fori_loop copy path and the masked remainder store).
    tpf3 = 50
    out3 = jax.block_until_ready(
        temporal_encoder_forward(temporal_coords, scale, embed_dim, tpf3))
    ref3 = _reference(temporal_coords, scale, embed_dim, tpf3)
    assert out3.shape == (B, T * tpf3, embed_dim)
    assert jnp.allclose(out3, ref3, atol=1e-5, rtol=1e-5)

    # 4) bf16 output path (halves HBM writeback).
    out4 = jax.block_until_ready(
        temporal_encoder_forward(temporal_coords, scale, embed_dim, tpf,
                                 out_dtype=jnp.bfloat16))
    assert out4.dtype == jnp.bfloat16
    assert jnp.allclose(out4.astype(jnp.float32), ref, atol=1e-2, rtol=1e-2)

    print("KERNEL_OK")
</pallas_src>

<mosaic_0001>
module attributes {stable_mosaic.version = 11 : i64} {
  func.func @kernel(%arg0: i32, %arg1: memref<1xf32, #tpu.memory_space<smem>>, %arg2: memref<16x2xf32, #tpu.memory_space<vmem>>, %arg3: memref<3x128xf32, #tpu.memory_space<vmem>>, %arg4: memref<16x128xf32, #tpu.memory_space<vmem>>) attributes {dimension_semantics = [#tpu.dimension_semantics<parallel>], iteration_bounds = array<i64: 1>, scalar_prefetch = 0 : i64, scratch_operands = 0 : i64, tpu.core_type = #tpu.core_type<tc>, window_params = [{transform_indices = @transform_0, window_bounds = array<i64: 1>}, {transform_indices = @transform_1, window_bounds = array<i64: 16, 2>}, {pipeline_mode = #tpu.pipeline_mode<synchronous>, transform_indices = @transform_2, window_bounds = array<i64: 3, 128>}, {transform_indices = @transform_3, window_bounds = array<i64: 16, 128>}]} {
    %c0 = arith.constant 0 : index
    %c0_0 = arith.constant 0 : index
    %0 = vector.load %arg2[%c0, %c0_0] : memref<16x2xf32, #tpu.memory_space<vmem>>, vector<16x1xf32>
    %c0_1 = arith.constant 0 : index
    %c1 = arith.constant 1 : index
    %1 = vector.load %arg2[%c0_1, %c1] : memref<16x2xf32, #tpu.memory_space<vmem>>, vector<16x1xf32>
    %c0_2 = arith.constant 0 : index
    %c0_3 = arith.constant 0 : index
    %2 = vector.load %arg3[%c0_2, %c0_3] : memref<3x128xf32, #tpu.memory_space<vmem>>, vector<1x128xf32>
    %c1_4 = arith.constant 1 : index
    %c0_5 = arith.constant 0 : index
    %3 = vector.load %arg3[%c1_4, %c0_5] : memref<3x128xf32, #tpu.memory_space<vmem>>, vector<1x128xf32>
    %c2 = arith.constant 2 : index
    %c0_6 = arith.constant 0 : index
    %4 = vector.load %arg3[%c2, %c0_6] : memref<3x128xf32, #tpu.memory_space<vmem>>, vector<1x128xf32>
    %cst = arith.constant 0.000000e+00 : f32
    %5 = vector.broadcast %cst : f32 to vector<1x128xf32>
    %6 = arith.cmpf one, %4, %5 : vector<1x128xf32>
    %7 = vector.broadcast %0 : vector<16x1xf32> to vector<16x128xf32>
    %8 = vector.broadcast %2 : vector<1x128xf32> to vector<16x128xf32>
    %9 = arith.mulf %7, %8 : vector<16x128xf32>
    %10 = vector.broadcast %1 : vector<16x1xf32> to vector<16x128xf32>
    %11 = vector.broadcast %3 : vector<1x128xf32> to vector<16x128xf32>
    %12 = arith.mulf %10, %11 : vector<16x128xf32>
    %13 = arith.addf %9, %12 : vector<16x128xf32>
    %14 = math.cos %13 : vector<16x128xf32>
    %15 = math.sin %13 : vector<16x128xf32>
    %16 = vector.shape_cast %6 : vector<1x128xi1> to vector<1x128xi1>
    %17 = vector.broadcast %16 : vector<1x128xi1> to vector<16x128xi1>
    %18 = arith.select %17, %14, %15 : vector<16x128xi1>, vector<16x128xf32>
    %c0_7 = arith.constant 0 : index
    %19 = memref.load %arg1[%c0_7] : memref<1xf32, #tpu.memory_space<smem>>
    %20 = vector.broadcast %19 : f32 to vector<16x128xf32>
    %21 = arith.mulf %20, %18 : vector<16x128xf32>
    %c0_8 = arith.constant 0 : index
    %c0_9 = arith.constant 0 : index
    %22 = vector.load %arg4[%c0_8, %c0_9] : memref<16x128xf32, #tpu.memory_space<vmem>>, vector<16x128xf32>
    tpu.vector_store %arg4[%c0_8, %c0_9], %21 {strides = array<i32>} : memref<16x128xf32, #tpu.memory_space<vmem>>, vector<16x128xf32>,
    return
  }
  func.func @transform_0(%arg0: i32) -> i32 {
    %c0_i32 = arith.constant 0 : i32
    %c0_i32_0 = arith.constant 0 : i32
    return %c0_i32 : i32
  }
  func.func @transform_1(%arg0: i32) -> (i32, i32) {
    %c0_i32 = arith.constant 0 : i32
    %c0_i32_0 = arith.constant 0 : i32
    return %arg0, %c0_i32 : i32, i32
  }
  func.func @transform_2(%arg0: i32) -> (i32, i32) {
    %c0_i32 = arith.constant 0 : i32
    %c0_i32_0 = arith.constant 0 : i32
    %c0_i32_1 = arith.constant 0 : i32
    return %c0_i32, %c0_i32_0 : i32, i32
  }
  func.func @transform_3(%arg0: i32) -> (i32, i32) {
    %c0_i32 = arith.constant 0 : i32
    %c0_i32_0 = arith.constant 0 : i32
    return %arg0, %c0_i32 : i32, i32
  }
}

</mosaic_0001>

<bundles_post_ra>
// kernel: tpu_custom_call.1
= control target key start
LH: loop header
LB: loop body
LE: loop exit
PB: predicated region body
PF: predicated region fallthrough
CT: control target
= control target key end

     0   :  { %v570_v1 = vmov 1   ;;  %v571_v2 = vmov 0   ;;  %s695_s0 = inlined_call_operand.<no memory space> [shape: f32[1], index: 0, kind: input, shape index: {}]   ;;  %s696_s1 = inlined_call_operand.vmem [shape: f32[16,2], index: 1, kind: input, shape index: {}]   ;;  %s697_s2 = inlined_call_operand.vmem [shape: f32[3,128], index: 2, kind: input, shape index: {}]   ;;  %s698_s3 = inlined_call_operand.hbm [shape: f32[16,128], index: 3, kind: output, shape index: {}]  }
   0x1   :  { %v16_v0 = vld [vmem:[%s696_s1] sm:$0xff]  ;;  %536 = vset.pattern.permute.xlu1 %v570_v1  ;;  %535 = vset.pattern.permute.xlu0 %v571_v2  ;;  %v17_v3 = vld [vmem:[%s696_s1 + $0x8] sm:$0xff] }
   0x2   :  { %39 = vperm.xlu1 %536, %v16_v0   ;;  %24 = vperm.xlu0 %535, %v16_v0  }
   0x3   :  { %9 = vsyncpa [#allocation4], 0  ;;  %v499_v4 = vld [vmem:[%s697_s2 + $0x1] ss:$0 sm:$0xff]  ;;  %v498_v5 = vld [vmem:[%s697_s2] ss:$0 sm:$0xff] }
   0x4   :  { %v572_v32 = vmov 683565275   ;;  %v573_v36 = vmov 2475754826   ;;  %v574_v38 = vmov 2131351028  }
   0x5   :  { %v575_v40 = vmov 2102212464   ;;  %v576_v42 = vmov 920167782   ;;  %v577_v49 = vmov 1326507024  }
   0x6   :  { %43 = vperm.xlu1 %536, %v17_v3   ;;  %29 = vperm.xlu0 %535, %v17_v3  }
   0xa   :  { %537 = vset.pattern.permute.xlu0 %v570_v1 }
  0x81   :  { %v40_v6 = vpop.permute.xlu1 %39  ;;  %v25_v7 = vpop.permute.xlu0 %24 }
  0x82   :  { %v50_v8 = vmul.f32 %v499_v4, %v40_v6  ;;  %v36_v9 = vmul.f32 %v498_v5, %v25_v7 }
  0x84   :  { %v614_v10 = vadd.f32 %v50_v8, %v36_v9 }
  0x85   :  { %v44_v11 = vpop.permute.xlu1 %43  ;;  %v30_v12 = vpop.permute.xlu0 %29 }
  0x86   :  { %v54_v13 = vand.u32 2147483647, %v614_v10  ;;  %v57_v14 = vand.u32 2139095040, %v614_v10  ;;  %v51_v15 = vmul.f32 %v499_v4, %v44_v11  ;;  %v37_v16 = vmul.f32 %v498_v5, %v30_v12 }
  0x87   :  { %vm56_vm14 = vcmp.lt.s32.totalorder %v614_v10, 0 }
  0x88   :  { %v58_v17 = vshrl.u32 %v57_v14, 23  ;;  %v61_v18 = vand.u32 8388607, %v54_v13  ;;  %v620_v19 = vadd.f32 %v51_v15, %v37_v16  ;;  %vm55_vm15 = vcmp.le.f32.partialorder %v54_v13, 0.7853982 }
  0x8a   :  { %v500_v20 = vadd.s32 4294967169, %v58_v17  ;;  %v160_v21 = vand.u32 2139095040, %v620_v19  ;;  %v62_v23 = vor.u32 8388608, %v61_v18  ;;  %v157_v25 = vand.u32 2147483647, %v620_v19 }
  0x8c   :  { %v64_v22 = vadd.s32 1, %v500_v20  ;;  %v161_v24 = vshrl.u32 %v160_v21, 23  ;;  %v624_v30 = vshll.u32 %v62_v23, 8  ;;  %v164_v34 = vand.u32 8388607, %v157_v25 }
  0x8e   :  { %vm65_vm0 = vcmp.gt.s32.totalorder %v64_v22, 0  ;;  %v504_v27 = vadd.s32 4294967169, %v161_v24  ;;  %v165_v0 = vor.u32 8388608, %v164_v34 }
  0x8f   :  { %v66_v26 = vsel %vm65_vm0, %v64_v22, 0 }
  0x90   :  { %v67_v28 = vshrl.u32 %v66_v26, 5  ;;  %v68_v29 = vand.u32 31, %v66_v26  ;;  %v167_v35 = vadd.s32 1, %v504_v27  ;;  %v205_v16 = vshll.u32 %v165_v0, 8 }
  0x92   :  { %v69_v31 = vsub.s32 32, %v68_v29  ;;  %v71_v33 = vshll.u32 %v572_v32, %v68_v29  ;;  %v74_v37 = vshll.u32 %v573_v36, %v68_v29  ;;  %v77_v39 = vshll.u32 %v574_v38, %v68_v29 }
  0x93   :  { %v80_v41 = vshll.u32 %v575_v40, %v68_v29  ;;  %v83_v43 = vshll.u32 %v576_v42, %v68_v29  ;;  %vm86_vm1 = vcmp.lt.s32.totalorder %v67_v28, 1  ;;  %vm88_vm2 = vcmp.lt.s32.totalorder %v67_v28, 3 }
  0x94   :  { %v72_v44 = vshrl.u32 %v573_v36, %v69_v31  ;;  %v75_v45 = vshrl.u32 %v574_v38, %v69_v31  ;;  %v78_v46 = vshrl.u32 %v575_v40, %v69_v31  ;;  %v70_v47 = vshrl.u32 %v572_v32, %v69_v31 }
  0x95   :  { %v81_v48 = vshrl.u32 %v576_v42, %v69_v31  ;;  %v84_v50 = vshrl.u32 %v577_v49, %v69_v31  ;;  %vm168_vm3 = vcmp.gt.s32.totalorder %v167_v35, 0  ;;  %vm89_vm4 = vcmp.lt.s32.totalorder %v67_v28, 4 }
  0x96   :  { %v73_v51 = vor.u32 %v72_v44, %v71_v33  ;;  %v76_v52 = vor.u32 %v75_v45, %v74_v37  ;;  %v79_v53 = vor.u32 %v78_v46, %v77_v39  ;;  %v169_v56 = vsel %vm168_vm3, %v167_v35, 0 }
  0x97   :  { %v82_v54 = vor.u32 %v81_v48, %v80_v41  ;;  %v85_v55 = vor.u32 %v84_v50, %v83_v43  ;;  %vm87_vm5 = vcmp.lt.s32.totalorder %v67_v28, 2  ;;  %v171_v4 = vand.u32 31, %v169_v56 }
  0x98   :  { %v90_v57 = vsel %vm86_vm1, %v70_v47, %v73_v51  ;;  %v91_v58 = vsel %vm89_vm4, %v79_v53, 2102212464  ;;  %v94_v59 = vsel %vm86_vm1, %v73_v51, %v76_v52  ;;  %v98_v60 = vsel %vm86_vm1, %v76_v52, %v79_v53 }
  0x99   :  { %v92_v61 = vsel %vm88_vm2, %v76_v52, %v91_v58  ;;  %v95_v62 = vsel %vm89_vm4, %v82_v54, 920167782  ;;  %v99_v63 = vsel %vm89_vm4, %v85_v55, 1326507024  ;;  %v170_v14 = vshrl.u32 %v169_v56, 5 }
  0x9a   :  { %v96_v1 = vsel %vm88_vm2, %v79_v53, %v95_v62  ;;  %v100_v3 = vsel %vm88_vm2, %v82_v54, %v99_v63  ;;  %v93_v5 = vsel %vm87_vm5, %v90_v57, %v92_v61  ;;  %v172_v15 = vsub.s32 32, %v171_v4 }
  0x9b   :  { %v97_v6 = vsel %vm87_vm5, %v94_v59, %v96_v1  ;;  %v101_v7 = vsel %vm87_vm5, %v98_v60, %v100_v3  ;;  %v109_v17 = vmul.u32 %v624_v30, %v93_v5  ;;  %v174_v18 = vshll.u32 %v572_v32, %v171_v4 }
  0x9c   :  { %v637_v8 = vmul.u32.u64.low %v624_v30, %v101_v7  ;;  %v638_v9 = vmul.u32.u64.high %v624_v30, %v101_v7, %v637_v8  ;;  %v641_v11 = vmul.u32.u64.low %v624_v30, %v97_v6  ;;  %v642_v12 = vmul.u32.u64.high %v624_v30, %v97_v6, %v641_v11 }
  0x9d   :  { %v177_v20 = vshll.u32 %v573_v36, %v171_v4  ;;  %v180_v21 = vshll.u32 %v574_v38, %v171_v4  ;;  %v175_v22 = vshrl.u32 %v573_v36, %v172_v15  ;;  %v178_v23 = vshrl.u32 %v574_v38, %v172_v15 }
  0x9e   :  { %v181_v24 = vshrl.u32 %v575_v40, %v172_v15  ;;  %v183_v26 = vshll.u32 %v575_v40, %v171_v4  ;;  %vm111_vm6 = vc.u32 %v638_v9, %v641_v11  ;;  %v112_v27 = vadd.s32 1, %v642_v12 }
  0x9f   :  { %v184_v28 = vshrl.u32 %v576_v42, %v172_v15  ;;  %v186_v29 = vshll.u32 %v576_v42, %v171_v4  ;;  %v176_v31 = vor.u32 %v175_v22, %v174_v18  ;;  %v179_v33 = vor.u32 %v178_v23, %v177_v20 }
  0xa0   :  { %v182_v34 = vor.u32 %v181_v24, %v180_v21  ;;  %v187_v35 = vshrl.u32 %v577_v49, %v172_v15  ;;  %v113_v30 = vsel %vm111_vm6, %v112_v27, %v642_v12  ;;  %vm189_vm7 = vcmp.lt.s32.totalorder %v170_v14, 1 }
  0xa1   :  { %v185_v37 = vor.u32 %v184_v28, %v183_v26  ;;  %vm192_vm8 = vcmp.lt.s32.totalorder %v170_v14, 4  ;;  %v114_v36 = vadd.s32 %v113_v30, %v109_v17  ;;  %vm191_vm9 = vcmp.lt.s32.totalorder %v170_v14, 3 }
  0xa2   :  { %v188_v38 = vor.u32 %v187_v35, %v186_v29  ;;  %v194_v39 = vsel %vm192_vm8, %v182_v34, 2102212464  ;;  %v173_v40 = vshrl.u32 %v572_v32, %v172_v15  ;;  %v197_v41 = vsel %vm189_vm7, %v176_v31, %v179_v33 }
  0xa3   :  { %v198_v43 = vsel %vm192_vm8, %v185_v37, 920167782  ;;  %v201_v44 = vsel %vm189_vm7, %v179_v33, %v182_v34  ;;  %v115_v45 = vadd.s32 536870912, %v114_v36  ;;  %vm190_vm10 = vcmp.lt.s32.totalorder %v170_v14, 2 }
  0xa4   :  { %v199_v42 = vsel %vm191_vm9, %v182_v34, %v198_v43  ;;  %v202_v46 = vsel %vm192_vm8, %v188_v38, 1326507024  ;;  %v193_v47 = vsel %vm189_vm7, %v173_v40, %v176_v31  ;;  %v195_v48 = vsel %vm191_vm9, %v179_v33, %v194_v39 }
  0xa5   :  { %v200_v49 = vsel %vm190_vm10, %v197_v41, %v199_v42  ;;  %v203_v50 = vsel %vm191_vm9, %v185_v37, %v202_v46  ;;  %v116_v51 = vshrl.u32 %v115_v45, 30  ;;  %v196_v57 = vsel %vm190_vm10, %v193_v47, %v195_v48 }
  0xa6   :  { %v204_v52 = vsel %vm190_vm10, %v201_v44, %v203_v50  ;;  %v652_v53 = vmul.u32.u64.low %v205_v16, %v200_v49  ;;  %v653_v54 = vmul.u32.u64.high %v205_v16, %v200_v49, %v652_v53  ;;  %v212_v60 = vmul.u32 %v205_v16, %v196_v57 }
  0xa7   :  { %v655_v55 = vmul.u32.u64.low %v205_v16, %v204_v52  ;;  %v656_v56 = vmul.u32.u64.high %v205_v16, %v204_v52, %v655_v55  ;;  %v117_v32 = vshll.u32 %v116_v51, 30  ;;  %v110_v12 = vadd.s32 %v641_v11, %v638_v9 }
  0xa8   :  { %v215_v59 = vadd.s32 1, %v653_v54  ;;  %v469_v31 = vlaneseq  ;;  %v140_v34 = vsub.s32 4, %v116_v51  ;;  %vm159_vm1 = vcmp.lt.s32.totalorder %v620_v19, 0 }
  0xa9   :  { %v118_v58 = vsub.s32 %v114_v36, %v117_v32  ;;  %vm214_vm11 = vc.u32 %v656_v56, %v652_v53  ;;  %v213_v9 = vadd.s32 %v652_v53, %v656_v56  ;;  %v20_v36 = vld [vmem:[%s697_s2 + $0x2] sm:$0x1]  ;;  %vm158_vm2 = vcmp.le.f32.partialorder %v157_v25, 0.7853982 }
  0xaa   :  { %v216_v62 = vsel %vm214_vm11, %v215_v59, %v653_v54  ;;  %v470_v41 = vshrl.u32 %v469_v31, 7  ;;  %v141_v44 = vsel %vm56_vm14, %v140_v34, %v116_v51  ;;  %vm21_vm0 = vcmp.ne.f32.partialorder %v20_v36, 0.0 }
  0xab   :  { %v120_v61 = vsub.s32 0, %v118_v58  ;;  %v217_v63 = vadd.s32 %v216_v62, %v212_v60  ;;  %v143_v47 = vsel %vm55_vm15, 0, %v141_v44  ;;  %v468_v50 = vsel %vm21_vm0, 1, %v571_v2 }
  0xac   :  { %v471_v49 = vsub.s32 0, %v470_v41  ;;  %v353_v54 = vadd.s32 3, %v143_v47  ;;  %v147_v32 = vand.u32 3, %v143_v47  ;;  %vm146_vm10 = vweird.f32 %v614_v10 }
  0xad   :  { %v501_v0 = vmin.u32 %v120_v61, %v118_v58  ;;  %v218_v1 = vadd.s32 536870912, %v217_v63 }
  0xae   :  { %v472_v13 = vrot.slane %v468_v50, %v471_v49  ;;  %v354_v57 = vand.u32 3, %v353_v54  ;;  %vm152_vm4 = vcmp.eq.s32.totalorder %v147_v32, 2  ;;  %vm149_vm6 = vcmp.eq.s32.totalorder %v147_v32, 0 }
  0xaf   :  { %v122_v3 = vclz %v501_v0  ;;  %v219_v4 = vshrl.u32 %v218_v1, 30  ;;  %vm148_vm8 = vcmp.lt.s32.totalorder %v147_v32, 2 }
  0xb0   :  { %vm473_vm3 = vcmp.eq.s32.totalorder %v472_v13, 1  ;;  %vm359_vm5 = vcmp.eq.s32.totalorder %v354_v57, 2  ;;  %vm356_vm7 = vcmp.eq.s32.totalorder %v354_v57, 0  ;;  %vm355_vm9 = vcmp.lt.s32.totalorder %v354_v57, 2 }
  0xb1   :  { %v502_v5 = vadd.s32 4294967294, %v122_v3  ;;  %v220_v6 = vshll.u32 %v219_v4, 30  ;;  %v243_v56 = vsub.s32 4, %v219_v4 }
  0xb3   :  { %vm503_vm12 = vcmp.lt.s32.totalorder %v502_v5, 0  ;;  %v221_v8 = vsub.s32 %v217_v63, %v220_v6  ;;  %v244_v59 = vsel %vm159_vm1, %v243_v56, %v219_v4  ;;  %v477_v63 = vstv %s695_s0  ;;  %s578_s0 = smov [#allocation3]  }
  0xb4   :  { %v125_v7 = vsel %vm503_vm12, 0, %v502_v5  ;;  %v246_v0 = vsel %vm158_vm2, 0, %v244_v59  ;;  %s487_s22 = sshll.u32 %s578_s0, 4  ;;  %s488_s22 = int_to_ptr.vmem [resolvable:$true] %s487_s22 }
  0xb5   :  { %v126_v14 = vsub.s32 32, %v125_v7  ;;  %v130_v15 = vsub.s32 4294967266, %v125_v7  ;;  %v223_v16 = vsub.s32 0, %v221_v8  ;;  %v127_v17 = vshll.u32 %v118_v58, %v125_v7  ;;  %s546_s23 = scalar_lea.vmem %s488_s22, 256  ;;  %p551_p1 = scmp.lt.s32.totalorder %s488_s22, %s488_s22 }
  0xb6   :  { %v457_v6 = vadd.s32 3, %v246_v0  ;;  %p547_p0 = scmp.ne.s32.totalorder %s488_s22, %s546_s23  ;;  %p552_p2 = scmp.lt.s32.totalorder %s546_s23, %s546_s23 }
  0xb7   :  { %v128_v18 = vshrl.u32 %v110_v12, %v126_v14  ;;  %v131_v20 = vadd.s32 127, %v130_v15  ;;  %v505_v21 = vmin.u32 %v223_v16, %v221_v8 }
  0xb8   :  { %p553_p3 = por %p552_p2, %p551_p1 }
  0xb9   :  { %v129_v22 = vor.u32 %v128_v18, %v127_v17  ;;  %v132_v23 = vshll.u32 %v131_v20, 23  ;;  %v225_v24 = vclz %v505_v21  ;;  %v250_v17 = vand.u32 3, %v246_v0 }
  0xba   :  { %v458_v18 = vand.u32 3, %v457_v6  ;;  %p554_p4 = pnand %p553_p3, %p547_p0 }
  0xbb   :  { %v133_v26 = vor.u32 4788187, %v132_v23  ;;  %v506_v27 = vadd.s32 4294967294, %v225_v24  ;;  %v136_v29 = vcvt.s32.f32 %v129_v22  ;;  %vm255_vm11 = vcmp.eq.s32.totalorder %v250_v17, 2 }
  0xbc   :  { %vm463_vm12 = vcmp.eq.s32.totalorder %v458_v18, 2  ;;  %vm459_vm0 = vcmp.lt.s32.totalorder %v458_v18, 2 }
  0xbd   :  { %v134_v28 = vand.u32 2147483647, %v133_v26  ;;  %vm507_vm13 = vcmp.lt.s32.totalorder %v506_v27, 0 }
  0xbe   :  { %v228_v35 = vsel %vm507_vm13, 0, %v506_v27  ;;  %vm252_vm13 = vcmp.eq.s32.totalorder %v250_v17, 0 }
  0xbf   :  { %v137_v33 = vmul.f32 %v136_v29, %v134_v28  ;;  %v229_v11 = vsub.s32 32, %v228_v35  ;;  %v233_v30 = vsub.s32 4294967266, %v228_v35  ;;  %v230_v38 = vshll.u32 %v221_v8, %v228_v35 }
  0xc1   :  { %v138_v37 = vxor.u32 2147483648, %v137_v33  ;;  %v231_v39 = vshrl.u32 %v213_v9, %v229_v11  ;;  %v234_v40 = vadd.s32 127, %v233_v30 }
  0xc3   :  { %v139_v43 = vsel %vm56_vm14, %v138_v37, %v137_v33  ;;  %v232_v42 = vor.u32 %v231_v39, %v230_v38  ;;  %v235_v46 = vshll.u32 %v234_v40, 23  ;;  %vm460_vm14 = vcmp.eq.s32.totalorder %v458_v18, 0 }
  0xc4   :  { %v142_v45 = vsel %vm55_vm15, %v614_v10, %v139_v43  ;;  %vm251_vm15 = vcmp.lt.s32.totalorder %v250_v17, 2 }
  0xc5   :  { %538 = vcosq.f32 %v142_v45  ;;  %v236_v48 = vor.u32 4788187, %v235_v46  ;;  %v239_v53 = vcvt.s32.f32 %v232_v42 }
  0xc6   :  { %540 = vsinq.f32 %v142_v45 }
  0xc7   :  { %v237_v52 = vand.u32 2147483647, %v236_v48 }
  0xc9   :  { %v240_v55 = vmul.f32 %v239_v53, %v237_v52 }
  0xcb   :  { %v241_v51 = vxor.u32 2147483648, %v240_v55 }
  0xcd   :  { %v242_v58 = vsel %vm159_vm1, %v241_v51, %v240_v55  ;;  %vm249_vm1 = vweird.f32 %v620_v19 }
  0xce   :  { %v245_v2 = vsel %vm158_vm2, %v620_v19, %v242_v58 }
  0xcf   :  { %v539_v60 = vpop.eup %538  ;;  %542 = vcosq.f32 %v245_v2 }
  0xd0   :  { %v541_v61 = vpop.eup %540  ;;  %v153_v62 = vxor.u32 2147483648, %v539_v60  ;;  %544 = vsinq.f32 %v245_v2 }
  0xd1   :  { %v150_v1 = vxor.u32 2147483648, %v541_v61 }
  0xd2   :  { %v154_v25 = vsel %vm152_vm4, %v153_v62, %v541_v61  ;;  %v361_v3 = vsel %vm359_vm5, %v153_v62, %v541_v61 }
  0xd3   :  { %v151_v4 = vsel %vm149_vm6, %v539_v60, %v150_v1  ;;  %v358_v5 = vsel %vm356_vm7, %v539_v60, %v150_v1 }
  0xd4   :  { %v155_v7 = vsel %vm148_vm8, %v151_v4, %v154_v25  ;;  %v362_v8 = vsel %vm355_vm9, %v358_v5, %v361_v3 }
  0xd5   :  { %v156_v12 = vsel %vm146_vm10, nan, %v155_v7  ;;  %v363_v14 = vsel %vm146_vm10, nan, %v362_v8 }
  0xd6   :  { %v474_v15 = vsel %vm473_vm3, %v156_v12, %v363_v14 }
  0xd7   :  { %v478_v16 = vmul.f32 %v477_v63, %v474_v15 }
  0xd9   :  { %480 = vst [vmem:[#allocation3] sm:$0xff] %v478_v16  ;;  %v543_v20 = vpop.eup %542 }
  0xda   :  { %v545_v21 = vpop.eup %544  ;;  %v256_v22 = vxor.u32 2147483648, %v543_v20 }
  0xdb   :  { %v253_v23 = vxor.u32 2147483648, %v545_v21 }
  0xdc   :  { %v257_v24 = vsel %vm255_vm11, %v256_v22, %v545_v21  ;;  %v465_v10 = vsel %vm463_vm12, %v256_v22, %v545_v21 }
  0xdd   :  { %v254_v26 = vsel %vm252_vm13, %v543_v20, %v253_v23  ;;  %v462_v27 = vsel %vm460_vm14, %v543_v20, %v253_v23 }
  0xde   :  { %v258_v28 = vsel %vm251_vm15, %v254_v26, %v257_v24  ;;  %v466_v29 = vsel %vm459_vm0, %v462_v27, %v465_v10 }
  0xdf   :  { %v259_v31 = vsel %vm249_vm1, nan, %v258_v28  ;;  %v467_v33 = vsel %vm249_vm1, nan, %v466_v29 }
  0xe0   :  { %v475_v34 = vsel %vm473_vm3, %v259_v31, %v467_v33 }
  0xe1   :  { %v479_v35 = vmul.f32 %v477_v63, %v475_v34 }
  0xe3   :  { %481 = vst [vmem:[#allocation3 + $0x8] sm:$0xff] %v479_v35 }
  0xe4   :  { %557 = shalt.err (!%p554_p4)
}
  0xe5   :  { %s558_s26 = scalar_lea.hbm %s698_s3, 256 }
  0xe6   :  { %p559_p5 = scmp.ne.s32.totalorder %s698_s3, %s558_s26  ;;  %p562_p6 = scmp.lt.u32.totalorder %s558_s26, %s698_s3 }
  0xe8   :  { %p564_p7 = pnand %p562_p6, %p559_p5 }
  0xea   :  { %567 = shalt.err (!%p564_p7)
}
  0xeb   :  { %s579_s4 = smov 128   ;;  %s580_s5 = smov 8  }
  0xec   :  { %493 = dma.vmem_to_hbm [thread:$0]  %s488_s22, 256, %s698_s3, [#allocation4], %s579_s4, %s579_s4, %s580_s5  }
  0xed   :  { %568 = dma.done.wait [#allocation4], 256  }
  0xee   :  { %569 = vsyncadd [#allocation4], 4294967040 }
  0xef   :  { %497 = vsyncpa [#allocation4], 1 }

</bundles_post_ra>
